<compile_context>
chip_gen: v7x
topology: tpu7x:2x2x1
jax: 0.10.0
libtpu: 0.0.40
codegen_flags: <defaults>
</compile_context>

<pallas_src>
import functools

import jax
import jax.numpy as jnp
from jax.experimental import pallas as pl
from jax.experimental.pallas import tpu as pltpu

EPS = 1e-5


def _round_up(x, m):
    return (x + m - 1) // m * m


def _to(x, dtype):
    return x if x.dtype == dtype else x.astype(dtype)


def _speaker_attn_kernel(x_ref, wq_ref, wkv_ref, wo_ref, o_ref, q_scr, kv_scr,
                         *, channels, t_real, t_pad, tq, mm_dtype):
    # x_ref: (1, C, Tp) full padded block for one batch element (constant over qi).
    # o_ref: (1, C, tq) query tile of the output.
    qi = pl.program_id(1)
    padded = t_pad != t_real  # static python bool

    # ---- once per batch element: TimeInstanceNorm + all projections -------
    @pl.when(qi == 0)
    def _project():
        x = x_ref[0]                                    # (C, Tp)
        xf = x.astype(jnp.float32)
        inv_t = jnp.float32(1.0 / t_real)

        # TODO(synk): TimeInstanceNorm is not defined in the reference source;
        # assumed (x - mean_T) / sqrt(var_T + eps), biased variance, no affine.
        # Padded time columns are zero, so the plain sum already equals the
        # sum over real positions; the variance sum is masked explicitly.
        mean = jnp.sum(xf, axis=1, keepdims=True) * inv_t          # (C, 1)
        xc = xf - mean
        if padded:
            t_ids = jax.lax.broadcasted_iota(jnp.int32, xf.shape, 1)
            xc_m = jnp.where(t_ids < t_real, xc, 0.0)
        else:
            xc_m = xc
        var = jnp.sum(xc_m * xc_m, axis=1, keepdims=True) * inv_t  # (C, 1)
        xn = xc * jax.lax.rsqrt(var + EPS)                          # (C, Tp)

        # Projections in (C, T) layout: y = W @ x (W is PyTorch (out, in)).
        # 1/sqrt(d_k) is already folded into wq; K/V weights packed as (2C, C).
        xm = x if x.dtype == mm_dtype else _to(xf, mm_dtype)
        q = jnp.dot(wq_ref[...], _to(xn, mm_dtype),
                    preferred_element_type=jnp.float32)             # (C, Tp)
        kv = jnp.dot(wkv_ref[...], xm,
                     preferred_element_type=jnp.float32)            # (2C, Tp)
        q_scr[...] = _to(q, mm_dtype)
        kv_scr[...] = _to(kv, mm_dtype)

    # ---- per query tile: scores -> softmax -> PV -> out proj -> residual --
    # 128-wide query chunks so exp (EUP) of one chunk can overlap the MXU
    # matmuls of another.
    n_inner = tq // 128
    for c in range(n_inner):
        off = pl.multiple_of(qi * tq + c * 128, 128)

        q_c = q_scr[:, pl.ds(off, 128)]                 # (C, 128)
        k = kv_scr[pl.ds(0, channels), :]               # (C, Tp)
        v = kv_scr[pl.ds(channels, channels), :]        # (C, Tp)

        # s[key, query] = sum_c k[c, key] * q[c, query]; the contraction is
        # over the small (C, ...) operands so any compiler-inserted transpose
        # stays off the (Tp, 128) result.
        s = jax.lax.dot_general(
            k, q_c, dimension_numbers=(((0,), (0,)), ((), ())),
            preferred_element_type=jnp.float32)          # (Tp, 128)
        if padded:
            key_ids = jax.lax.broadcasted_iota(jnp.int32, s.shape, 0)
            s = jnp.where(key_ids < t_real, s, jnp.float32(-1e30))

        # softmax over keys (axis 0); normalization deferred to post-PV.
        m = jnp.max(s, axis=0, keepdims=True)            # (1, 128)
        p = jnp.exp(s - m)                               # (Tp, 128)
        l = jnp.sum(p, axis=0, keepdims=True)            # (1, 128)

        out = jnp.dot(v, _to(p, mm_dtype),
                      preferred_element_type=jnp.float32)            # (C, 128)
        out = out * pl.reciprocal(l, approx=False)
        out = jnp.dot(wo_ref[...], _to(out, mm_dtype),
                      preferred_element_type=jnp.float32)            # (C, 128)

        xt = x_ref[0, :, pl.ds(off, 128)].astype(jnp.float32)
        o_ref[0, :, c * 128:(c + 1) * 128] = (xt + out).astype(o_ref.dtype)


def speaker_attention(x_nct, w_q, w_k, w_v, w_o):
    """x_nct: (B, C, T); w_*: (C, C) in PyTorch (out, in) layout."""
    B, C, T = x_nct.shape
    d_k = float(C) ** 0.5

    # bf16 operands (with f32 accumulation) only when the input is bf16.
    mm_dtype = jnp.bfloat16 if x_nct.dtype == jnp.bfloat16 else jnp.float32

    # Fold the 1/sqrt(d_k) scale into the query weight once; pack K/V weights.
    wq_s = (w_q.astype(jnp.float32) / d_k).astype(mm_dtype)           # (C, C)
    wkv = jnp.concatenate([w_k, w_v], axis=0).astype(mm_dtype)        # (2C, C)
    wo = w_o.astype(mm_dtype)                                         # (C, C)

    # --- lane-dense padded time axis and query-tile size -------------------
    Tp = _round_up(T, 128)
    if Tp <= 512:
        tq = Tp
    else:
        tq = 128
        for cand in (512, 384, 256):
            if Tp % cand == 0:
                tq = cand
                break
    num_q = Tp // tq

    x_in = jnp.pad(x_nct, ((0, 0), (0, 0), (0, Tp - T))) if Tp != T else x_nct

    kernel = functools.partial(
        _speaker_attn_kernel, channels=C, t_real=T, t_pad=Tp, tq=tq,
        mm_dtype=mm_dtype)

    in_item = jnp.dtype(x_nct.dtype).itemsize
    w_item = jnp.dtype(mm_dtype).itemsize

    cost = pl.CostEstimate(
        flops=int(2 * B * (4 * Tp * C * C + 2 * Tp * Tp * C)),
        transcendentals=int(B * Tp * Tp),
        bytes_accessed=int(2 * B * C * Tp * in_item + 4 * C * C * w_item),
    )

    # Generation-gated VMEM limit: ~0.72x of physical capacity leaves headroom
    # for double-buffered weights + compiler internal scratch on every chip.
    try:
        vmem_cap = int(pltpu.get_tpu_info().vmem_capacity_bytes)
    except Exception:
        vmem_cap = 64 << 20  # conservative (v7x)
    cap = int(vmem_cap * 0.72)

    step_bytes = (
        2 * C * Tp * in_item            # x block (double buffered, DMA'd once per b)
        + 8 * C * C * w_item            # weight buffers
        + 2 * C * tq * in_item          # output block
        + 3 * C * Tp * w_item           # q / kv VMEM scratch
        + 4 * C * Tp * 4                # f32 intermediates of the projection step
        + 2 * Tp * 128 * 4              # score / prob chunk
        + 3 * C * 128 * 4)              # PV / out-proj chunk
    vmem_limit = int(min(max(step_bytes * 5 // 4, 32 << 20), cap))

    out_p = pl.pallas_call(
        kernel,
        out_shape=jax.ShapeDtypeStruct((B, C, Tp), x_nct.dtype),
        grid_spec=pltpu.PrefetchScalarGridSpec(
            num_scalar_prefetch=0,
            grid=(B, num_q),
            in_specs=[
                # Full padded time block; block index constant over qi -> no re-DMA.
                pl.BlockSpec((1, C, Tp), lambda b, q: (b, 0, 0)),
                pl.BlockSpec((C, C), lambda b, q: (0, 0)),
                pl.BlockSpec((2 * C, C), lambda b, q: (0, 0)),
                pl.BlockSpec((C, C), lambda b, q: (0, 0)),
            ],
            out_specs=pl.BlockSpec((1, C, tq), lambda b, q: (b, 0, q)),
            scratch_shapes=[
                pltpu.VMEM((C, Tp), mm_dtype),       # q projection (full T)
                pltpu.VMEM((2 * C, Tp), mm_dtype),   # packed k/v projections
            ],
        ),
        compiler_params=pltpu.CompilerParams(
            dimension_semantics=("parallel", "arbitrary"),
            vmem_limit_bytes=vmem_limit,
        ),
        cost_estimate=cost,
    )(x_in, wq_s, wkv, wo)

    return out_p[:, :, :T] if Tp != T else out_p


def _reference(x_nct, w_q, w_k, w_v, w_o):
    """Pure-JAX reference mirroring the PyTorch forward."""
    B, C, T = x_nct.shape
    d_k = float(C) ** 0.5
    mean = jnp.mean(x_nct, axis=2, keepdims=True)
    var = jnp.mean((x_nct - mean) ** 2, axis=2, keepdims=True)
    xn = (x_nct - mean) / jnp.sqrt(var + EPS)
    q = jnp.einsum("bct,oc->bto", xn, w_q)
    k = jnp.einsum("bct,oc->bto", x_nct, w_k)
    v = jnp.einsum("bct,oc->bto", x_nct, w_v)
    attn = jnp.einsum("btc,bsc->bts", q / d_k, k)
    attn = jax.nn.softmax(attn, axis=-1)
    out = jnp.einsum("bts,bsc->btc", attn, v)
    out = jnp.einsum("btc,oc->bto", out, w_o)
    return x_nct + jnp.transpose(out, (0, 2, 1))


if __name__ == "__main__":
    B, C, T = 2, 32, 16
    key = jax.random.PRNGKey(0)
    kx, kq, kk, kv, ko = jax.random.split(key, 5)

    x = jax.random.normal(kx, (B, C, T), dtype=jnp.float32)
    # deterministic nn.Linear-style init (uniform in +/- 1/sqrt(fan_in))
    bound = 1.0 / (C ** 0.5)
    w_q = jax.random.uniform(kq, (C, C), jnp.float32, -bound, bound)
    w_k = jax.random.uniform(kk, (C, C), jnp.float32, -bound, bound)
    w_v = jax.random.uniform(kv, (C, C), jnp.float32, -bound, bound)
    w_o = jax.random.uniform(ko, (C, C), jnp.float32, -bound, bound)

    out = speaker_attention(x, w_q, w_k, w_v, w_o)
    out = jax.block_until_ready(out)

    ref = _reference(x, w_q, w_k, w_v, w_o)
    assert out.shape == (B, C, T)
    assert jnp.allclose(out, ref, atol=1e-4, rtol=1e-4), "mismatch vs reference"

    print("KERNEL_OK")
</pallas_src>

<mosaic_0001>
module attributes {stable_mosaic.version = 11 : i64} {
  func.func @_speaker_attn_kernel(%arg0: i32, %arg1: i32, %arg2: memref<1x32x128xf32, #tpu.memory_space<vmem>>, %arg3: memref<32x32xf32, #tpu.memory_space<vmem>>, %arg4: memref<64x32xf32, #tpu.memory_space<vmem>>, %arg5: memref<32x32xf32, #tpu.memory_space<vmem>>, %arg6: memref<1x32x128xf32, #tpu.memory_space<vmem>>, %arg7: memref<32x128xf32, #tpu.memory_space<vmem>>, %arg8: memref<64x128xf32, #tpu.memory_space<vmem>>) attributes {dimension_semantics = [#tpu.dimension_semantics<parallel>, #tpu.dimension_semantics<arbitrary>], iteration_bounds = array<i64: 2, 1>, scalar_prefetch = 0 : i64, scratch_operands = 2 : i64, tpu.core_type = #tpu.core_type<tc>, window_params = [{transform_indices = @transform_0, window_bounds = array<i64: 1, 32, 128>}, {pipeline_mode = #tpu.pipeline_mode<synchronous>, transform_indices = @transform_1, window_bounds = array<i64: 32, 32>}, {pipeline_mode = #tpu.pipeline_mode<synchronous>, transform_indices = @transform_2, window_bounds = array<i64: 64, 32>}, {pipeline_mode = #tpu.pipeline_mode<synchronous>, transform_indices = @transform_3, window_bounds = array<i64: 32, 32>}, {transform_indices = @transform_4, window_bounds = array<i64: 1, 32, 128>}]} {
    %c0_i32 = arith.constant 0 : i32
    %0 = arith.cmpi eq, %arg1, %c0_i32 : i32
    %1 = arith.extui %0 : i1 to i32
    %c0_i32_0 = arith.constant 0 : i32
    %2 = arith.cmpi ne, %1, %c0_i32_0 : i32
    scf.if %2 {
      %c0_17 = arith.constant 0 : index
      %c0_18 = arith.constant 0 : index
      %c0_19 = arith.constant 0 : index
      %36 = vector.load %arg2[%c0_17, %c0_18, %c0_19] : memref<1x32x128xf32, #tpu.memory_space<vmem>>, vector<1x32x128xf32>
      %37 = vector.shape_cast %36 : vector<1x32x128xf32> to vector<32x128xf32>
      %cst_20 = arith.constant dense<0.000000e+00> : vector<32xf32>
      %38 = vector.multi_reduction <add>, %37, %cst_20 [1] : vector<32x128xf32> to vector<32xf32>
      %39 = vector.shape_cast %38 : vector<32xf32> to vector<32x1xf32>
      %cst_21 = arith.constant 6.250000e-02 : f32
      %40 = vector.broadcast %cst_21 : f32 to vector<32x1xf32>
      %41 = arith.mulf %39, %40 : vector<32x1xf32>
      %42 = vector.broadcast %41 : vector<32x1xf32> to vector<32x128xf32>
      %43 = arith.subf %37, %42 : vector<32x128xf32>
      %44 = tpu.iota {dimensions = array<i32: 1>} : vector<32x128xi32>
      %c16_i32_22 = arith.constant 16 : i32
      %45 = vector.broadcast %c16_i32_22 : i32 to vector<32x128xi32>
      %46 = arith.cmpi slt, %44, %45 : vector<32x128xi32>
      %cst_23 = arith.constant 0.000000e+00 : f32
      %47 = vector.broadcast %cst_23 : f32 to vector<32x128xf32>
      %48 = arith.select %46, %43, %47 : vector<32x128xi1>, vector<32x128xf32>
      %49 = arith.mulf %48, %48 : vector<32x128xf32>
      %cst_24 = arith.constant dense<0.000000e+00> : vector<32xf32>
      %50 = vector.multi_reduction <add>, %49, %cst_24 [1] : vector<32x128xf32> to vector<32xf32>
      %51 = vector.shape_cast %50 : vector<32xf32> to vector<32x1xf32>
      %cst_25 = arith.constant 6.250000e-02 : f32
      %52 = vector.broadcast %cst_25 : f32 to vector<32x1xf32>
      %53 = arith.mulf %51, %52 : vector<32x1xf32>
      %cst_26 = arith.constant 9.99999974E-6 : f32
      %54 = vector.broadcast %cst_26 : f32 to vector<32x1xf32>
      %55 = arith.addf %53, %54 : vector<32x1xf32>
      %56 = math.rsqrt %55 : vector<32x1xf32>
      %57 = vector.broadcast %56 : vector<32x1xf32> to vector<32x128xf32>
      %58 = arith.mulf %43, %57 : vector<32x128xf32>
      %c0_27 = arith.constant 0 : index
      %c0_28 = arith.constant 0 : index
      %59 = vector.load %arg3[%c0_27, %c0_28] : memref<32x32xf32, #tpu.memory_space<vmem>>, vector<32x32xf32>
      %cst_29 = arith.constant dense<0.000000e+00> : vector<32x128xf32>
      %60 = tpu.matmul %59, %58, %cst_29 {dimension_numbers = #tpu.dot_dimension_numbers<[1], [0], [0], [1], [0, 0, 1, 1], [], []>} : vector<32x32xf32>, vector<32x128xf32>, vector<32x128xf32> -> vector<32x128xf32>
      %c0_30 = arith.constant 0 : index
      %c0_31 = arith.constant 0 : index
      %61 = vector.load %arg4[%c0_30, %c0_31] : memref<64x32xf32, #tpu.memory_space<vmem>>, vector<64x32xf32>
      %cst_32 = arith.constant dense<0.000000e+00> : vector<64x128xf32>
      %62 = tpu.matmul %61, %37, %cst_32 {dimension_numbers = #tpu.dot_dimension_numbers<[1], [0], [0], [1], [0, 0, 1, 1], [], []>} : vector<64x32xf32>, vector<32x128xf32>, vector<64x128xf32> -> vector<64x128xf32>
      %c0_33 = arith.constant 0 : index
      %c0_34 = arith.constant 0 : index
      %63 = vector.load %arg7[%c0_33, %c0_34] : memref<32x128xf32, #tpu.memory_space<vmem>>, vector<32x128xf32>
      tpu.vector_store %arg7[%c0_33, %c0_34], %60 {strides = array<i32>} : memref<32x128xf32, #tpu.memory_space<vmem>>, vector<32x128xf32>,
      %c0_35 = arith.constant 0 : index
      %c0_36 = arith.constant 0 : index
      %64 = vector.load %arg8[%c0_35, %c0_36] : memref<64x128xf32, #tpu.memory_space<vmem>>, vector<64x128xf32>
      tpu.vector_store %arg8[%c0_35, %c0_36], %62 {strides = array<i32>} : memref<64x128xf32, #tpu.memory_space<vmem>>, vector<64x128xf32>,
    } else {
    }
    %c128_i32 = arith.constant 128 : i32
    %3 = arith.muli %arg1, %c128_i32 : i32
    %c0_i32_1 = arith.constant 0 : i32
    %4 = arith.addi %3, %c0_i32_1 : i32
    %5 = tpu.assume_multiple %4, 128 : i32
    %c0 = arith.constant 0 : index
    %6 = arith.index_cast %5 : i32 to index
    %7 = vector.load %arg7[%c0, %6] : memref<32x128xf32, #tpu.memory_space<vmem>>, vector<32x128xf32>
    %c0_2 = arith.constant 0 : index
    %c0_3 = arith.constant 0 : index
    %8 = vector.load %arg8[%c0_2, %c0_3] : memref<64x128xf32, #tpu.memory_space<vmem>>, vector<32x128xf32>
    %c32 = arith.constant 32 : index
    %c0_4 = arith.constant 0 : index
    %9 = vector.load %arg8[%c32, %c0_4] : memref<64x128xf32, #tpu.memory_space<vmem>>, vector<32x128xf32>
    %cst = arith.constant dense<0.000000e+00> : vector<128x128xf32>
    %10 = tpu.matmul %8, %7, %cst {dimension_numbers = #tpu.dot_dimension_numbers<[0], [0], [1], [1], [0, 1, 1, 1], [], []>} : vector<32x128xf32>, vector<32x128xf32>, vector<128x128xf32> -> vector<128x128xf32>
    %11 = tpu.iota {dimensions = array<i32: 0>} : vector<128x128xi32>
    %c16_i32 = arith.constant 16 : i32
    %12 = vector.broadcast %c16_i32 : i32 to vector<128x128xi32>
    %13 = arith.cmpi slt, %11, %12 : vector<128x128xi32>
    %cst_5 = arith.constant -1.000000e+30 : f32
    %14 = vector.broadcast %cst_5 : f32 to vector<128x128xf32>
    %15 = arith.select %13, %10, %14 : vector<128x128xi1>, vector<128x128xf32>
    %cst_6 = arith.constant dense<0xFF800000> : vector<128xf32>
    %16 = vector.multi_reduction <maximumf>, %15, %cst_6 [0] : vector<128x128xf32> to vector<128xf32>
    %17 = vector.shape_cast %16 : vector<128xf32> to vector<1x128xf32>
    %18 = vector.broadcast %17 : vector<1x128xf32> to vector<128x128xf32>
    %19 = arith.subf %15, %18 : vector<128x128xf32>
    %20 = math.exp %19 : vector<128x128xf32>
    %cst_7 = arith.constant dense<0.000000e+00> : vector<128xf32>
    %21 = vector.multi_reduction <add>, %20, %cst_7 [0] : vector<128x128xf32> to vector<128xf32>
    %22 = vector.shape_cast %21 : vector<128xf32> to vector<1x128xf32>
    %cst_8 = arith.constant dense<0.000000e+00> : vector<32x128xf32>
    %23 = tpu.matmul %9, %20, %cst_8 {dimension_numbers = #tpu.dot_dimension_numbers<[1], [0], [0], [1], [0, 0, 1, 1], [], []>} : vector<32x128xf32>, vector<128x128xf32>, vector<32x128xf32> -> vector<32x128xf32>
    %24 = tpu.reciprocal %22 : vector<1x128xf32> -> vector<1x128xf32>
    %25 = vector.broadcast %24 : vector<1x128xf32> to vector<32x128xf32>
    %26 = arith.mulf %23, %25 : vector<32x128xf32>
    %c0_9 = arith.constant 0 : index
    %c0_10 = arith.constant 0 : index
    %27 = vector.load %arg5[%c0_9, %c0_10] : memref<32x32xf32, #tpu.memory_space<vmem>>, vector<32x32xf32>
    %cst_11 = arith.constant dense<0.000000e+00> : vector<32x128xf32>
    %28 = tpu.matmul %27, %26, %cst_11 {dimension_numbers = #tpu.dot_dimension_numbers<[1], [0], [0], [1], [0, 0, 1, 1], [], []>} : vector<32x32xf32>, vector<32x128xf32>, vector<32x128xf32> -> vector<32x128xf32>
    %c0_12 = arith.constant 0 : index
    %c0_13 = arith.constant 0 : index
    %29 = arith.index_cast %5 : i32 to index
    %30 = vector.load %arg2[%c0_12, %c0_13, %29] : memref<1x32x128xf32, #tpu.memory_space<vmem>>, vector<1x32x128xf32>
    %31 = vector.shape_cast %30 : vector<1x32x128xf32> to vector<32x128xf32>
    %32 = arith.addf %31, %28 : vector<32x128xf32>
    %c0_14 = arith.constant 0 : index
    %c0_15 = arith.constant 0 : index
    %c0_16 = arith.constant 0 : index
    %33 = vector.load %arg6[%c0_14, %c0_15, %c0_16] : memref<1x32x128xf32, #tpu.memory_space<vmem>>, vector<1x32x128xf32>
    %34 = vector.shape_cast %33 : vector<1x32x128xf32> to vector<32x128xf32>
    %35 = vector.shape_cast %32 : vector<32x128xf32> to vector<1x32x128xf32>
    tpu.vector_store %arg6[%c0_14, %c0_15, %c0_16], %35 {strides = array<i32>} : memref<1x32x128xf32, #tpu.memory_space<vmem>>, vector<1x32x128xf32>,
    return
  }
  func.func @transform_0(%arg0: i32, %arg1: i32) -> (i32, i32, i32) {
    %c0_i32 = arith.constant 0 : i32
    %c0_i32_0 = arith.constant 0 : i32
    %c0_i32_1 = arith.constant 0 : i32
    return %arg0, %c0_i32, %c0_i32_0 : i32, i32, i32
  }
  func.func @transform_1(%arg0: i32, %arg1: i32) -> (i32, i32) {
    %c0_i32 = arith.constant 0 : i32
    %c0_i32_0 = arith.constant 0 : i32
    %c0_i32_1 = arith.constant 0 : i32
    return %c0_i32, %c0_i32_0 : i32, i32
  }
  func.func @transform_2(%arg0: i32, %arg1: i32) -> (i32, i32) {
    %c0_i32 = arith.constant 0 : i32
    %c0_i32_0 = arith.constant 0 : i32
    %c0_i32_1 = arith.constant 0 : i32
    return %c0_i32, %c0_i32_0 : i32, i32
  }
  func.func @transform_3(%arg0: i32, %arg1: i32) -> (i32, i32) {
    %c0_i32 = arith.constant 0 : i32
    %c0_i32_0 = arith.constant 0 : i32
    %c0_i32_1 = arith.constant 0 : i32
    return %c0_i32, %c0_i32_0 : i32, i32
  }
  func.func @transform_4(%arg0: i32, %arg1: i32) -> (i32, i32, i32) {
    %c0_i32 = arith.constant 0 : i32
    %c0_i32_0 = arith.constant 0 : i32
    return %arg0, %c0_i32, %arg1 : i32, i32, i32
  }
}

</mosaic_0001>

<bundles_post_ra>
// kernel: tpu_custom_call.1
= control target key start
LH: loop header
LB: loop body
LE: loop exit
PB: predicated region body
PF: predicated region fallthrough
CT: control target
= control target key end

     0   :  { %9 = vsyncpa [#allocation5], 0  ;;  %s2008_s0 = inlined_call_operand.vmem [shape: f32[2,32,128], index: 0, kind: input, shape index: {}]   ;;  %s2009_s1 = inlined_call_operand.vmem [shape: f32[32,32], index: 1, kind: input, shape index: {}]   ;;  %s2010_s2 = inlined_call_operand.vmem [shape: f32[64,32], index: 2, kind: input, shape index: {}]   ;;  %s2011_s3 = inlined_call_operand.hbm [shape: f32[32,32], index: 3, kind: input, shape index: {}]   ;;  %s2012_s4 = inlined_call_operand.hbm [shape: f32[2,32,128], index: 4, kind: output, shape index: {}]  }
   0x1   :  { %10 = vsyncpa [#allocation6], 0 }
   0x2   :  { %12 = vsyncpa [#allocation6 + $0x1], 0  ;;  %s1754_s15 = smov 0   ;;  %s1756_s16 = smov 0  }
   0x3   :  { %s1758_s17 = smov 0   ;;  %s1760_s18 = smov 0  }
   0x4   :  { %s1762_s19 = smov 0   ;;  %s1764_s20 = smov 0  }
   0x5 LB: > { %s1221_s21 = sadd.s32 4294967295, %s1721_s20   ;;  %s1222_s22 = sadd.s32 4294967294, %s1721_s20   ;;  %s1721_s20 = sphi %s1764_s20, %s18_s20   ;;  %s1717_s19 = sphi %s1762_s19, %s2030_s19   ;;  %s1713_s18 = sphi %s1760_s18, %s2029_s18   ;;  %s1709_s17 = sphi %s1758_s17, %s2028_s17   ;;  %s1705_s16 = sphi %s1756_s16, %s2027_s16   ;;  %s1701_s15 = sphi %s1754_s15, %s2026_s15  }
   0x6   : > { %s30_s23 = sadd.s32 1, %s1717_s19  ;;  %s128_s24 = sadd.s32 1, %s1709_s17 }
   0x7   : > { %p32_p0 = scmp.ge.s32.totalorder %s30_s23, 2  ;;  %p138_p1 = scmp.ne.s32.totalorder %s1709_s17, %s1705_s16 }
   0x8   : > { %p139_p2 = scmp.eq.s32.totalorder %s1221_s21, 1  ;;  %p144_p3 = scmp.ne.s32.totalorder %s1705_s16, %s1701_s15 }
   0x9   : > { %s2032_s23 = smov (%p32_p0, %s30_s23), 0  ;;  %p145_p5 = scmp.eq.s32.totalorder %s1222_s22, 1 }
   0xa   : > { %p1794_p4 = por %p139_p2, %p138_p1  ;;  %s123_s26 = ssub.s32 %s1717_s19, %s2032_s23 }
   0xb   : > { %p1223_p6 = scmp.ge.s32.totalorder %s1721_s20, 1  ;;  %p126_p7 = scmp.eq.s32.totalorder %s123_s26, 0 }
   0xc   : > { %s2017_s25 = scalar_select %p1794_p4, 1, 0 }
   0xd   : > { %p1801_p8 = por %p145_p5, %p144_p3  ;;  %p152_p9 = scmp.lt.s32.totalorder %s1721_s20, 3 }
   0xe   : > { %s1807_s28 = scalar_select %p126_p7, %s1709_s17, %s128_s24  }
   0xf   : > { %s2018_s27 = scalar_select %p1801_p8, 1, 0 }
  0x10   : > { %p1809_p10 = pnand %p1223_p6, %p152_p9  ;;  %p1813_p11 = scmp.eq.s32.totalorder %s1221_s21, 0 }
  0x11   : > { %s1723_s5 = smov [#allocation4]   ;;  %s1611_s10 = scalar_lea.hbm %s2011_s3, 512 }
  0x12   : > { %s2019_s29 = scalar_select %p1809_p10, 1, 0 }
  0x13   : > { %s2020_s30 = scalar_select %p1813_p11, 1, 0 }
  0x14   : > { %p1530_p12 = pneg %p1809_p10  ;;  %s170_s6 = sshll.u32 %s1723_s5, 4  ;;  %s171_s6 = int_to_ptr.vmem [resolvable:$true] %s170_s6 }
  0x15   : > { %p1612_p0 = scmp.ne.s32.totalorder %s2011_s3, %s1611_s10  ;;  %p1618_p5 = scmp.lt.u32.totalorder %s1611_s10, %s2011_s3 }
  0x16   : > { %p1821_p13 = pnand %p1813_p11, %p1530_p12 }
  0x18   : > { %p1613_p1 = pneg %p1821_p13 }
  0x1a   : > { %p1614_p2 = pnand %p1613_p1, %p1612_p0 }
  0x1c   : > { %p1615_p3 = pneg %p1614_p2 }
  0x1e   : > { %p1620_p6 = pnand %p1618_p5, %p1615_p3 }
  0x20   : > { %1623 = shalt.err (!%p1620_p6)
}
  0x21   : > { %s1624_s21 = scalar_lea.vmem %s171_s6, 512  ;;  %p1632_p8 = scmp.lt.s32.totalorder %s171_s6, %s171_s6 }
  0x22   : > { %p1625_p7 = scmp.ne.s32.totalorder %s171_s6, %s1624_s21  ;;  %p1633_p4 = scmp.lt.s32.totalorder %s1624_s21, %s1624_s21 }
  0x24   : > { %p1627_p9 = pnand %p1625_p7, %p1613_p1  ;;  %p1634_p11 = por %p1633_p4, %p1632_p8 }
  0x26   : > { %p1628_p12 = pneg %p1627_p9 }
  0x28   : > { %p1635_p10 = pnand %p1634_p11, %p1628_p12 }
  0x2a   : > { %1638 = shalt.err (!%p1635_p10)
}
  0x2b   : > { %s1724_s22 = smov 128   ;;  %s1725_s24 = smov 8  }
  0x2c   : > { %1533 = dma.hbm_to_vmem [thread:$0]  (!%p1821_p13), %s2011_s3, 512, %s171_s6, [#allocation5], %s1724_s22, %s1724_s22, %s1725_s24  }
  0x2d   : > { %p2022_p0 = scmp.ne.s32.totalorder %s2019_s29, 0 }
  0x2e   : > { %p2023_p2 = scmp.ne.s32.totalorder (!%p2022_p0), %s2020_s30, 0 }
  0x2f   : > { %194 = sbr.rel (%p2022_p0) target bundleno = 1347 (0x543), region = 36 }
  0x36   : > { %1692 = dma.done.wait (%p2023_p2), [#allocation5], 512  }
  0x37   : > { %1694 = vsyncadd (%p2023_p2), [#allocation5], 4294966784  ;;  %p220_p4 = scmp.lt.s32.totalorder %s1713_s18, 1  ;;  %vm288_vm0 = vcmask 261120   ;;  %v386_v6 = vld [vmem:[%s2010_s2] sm:$0xff]  ;;  %v387_v7 = vld [vmem:[%s2010_s2 + $0x8] sm:$0xff]  ;;  %v249_v10 = vlaneseq }
  0x38   : > { %1360 = vmatprep.mubr.msk.f32.mxu1 %vm288_vm0, %v386_v6  ;;  %v388_v8 = vld [vmem:[%s2010_s2 + $0x10] sm:$0xff]  ;;  %v389_v9 = vld [vmem:[%s2010_s2 + $0x18] sm:$0xff]  ;;  %v284_v32 = vld [vmem:[%s2009_s1] sm:$0xff]  ;;  %s217_s24 = sand.u32 1, %s1705_s16   ;;  %p2024_p10 = scmp.ne.s32.totalorder %s2017_s25, 0 }
  0x39   : > { %s221_s8 = scalar_select %p220_p4, %s1713_s18, 1  ;;  %v250_v11 = vand.u32 127, %v249_v10  ;;  %1346 = vmatprep.mubr.msk.f32.mxu0 %vm288_vm0, %v284_v32  ;;  %v285_v59 = vld [vmem:[%s2009_s1 + $0x8] sm:$0xff]  ;;  %v286_v60 = vld [vmem:[%s2009_s1 + $0x10] sm:$0xff]  ;;  %v287_v61 = vld [vmem:[%s2009_s1 + $0x18] sm:$0xff] }
  0x3a   : > { %v390_v63 = vld [vmem:[%s2010_s2 + $0x20] sm:$0xff]  ;;  %v393_v6 = vld [vmem:[%s2010_s2 + $0x38] sm:$0xff]  ;;  %s1228_s26 = sshll.u32 %s217_s24, 5  ;;  %s1726_s30 = smov [#allocation7]  }
  0x3b   : > { %s1268_s9 = sshll.u32 %s221_s8, 5  ;;  %vm251_vm1 = vcmp.lt.s32.totalorder %v250_v11, 16  ;;  %s219_s5 = scalar_lea.vmem [#allocation7], %s1228_s26 }
  0x3c   : > { %s224_s11 = scalar_lea.vmem %s2008_s0, %s1268_s9  ;;  %s1135_s8 = sshll.u32 %s219_s5, 4  ;;  %s1952_s8 = int_to_ptr.vmem [resolvable:$true] %s1135_s8 }
  0x3d   : > { %v1852_v0 = vld [vmem:[%s224_s11] sm:$0xff]  ;;  %v1854_v1 = vld [vmem:[%s224_s11 + $0x10] sm:$0xff]  ;;  %v1858_v2 = vld [vmem:[%s224_s11 + $0x8] sm:$0xff]  ;;  %s1269_s9 = sshll.u32 %s1713_s18, 9  ;;  %s1962_s18 = scalar_lea.sflag [#allocation6], %s217_s24 }
  0x3e   : > { %233 = vadd.xlane.f32.xlu0 %v1852_v0  ;;  %237 = vadd.xlane.f32.xlu1 %v1854_v1  ;;  %v1860_v3 = vld [vmem:[%s224_s11 + $0x18] sm:$0xff]  ;;  %v1464_v4 = vpack.c.bf16 %v1858_v2, %v1852_v0  ;;  %s1958_s11 = scalar_lea.hbm %s2012_s4, %s1269_s9  ;;  %s1639_s29 = scalar_lea.vmem %s1952_s8, 512 }
  0x3f   : > { %v1468_v5 = vpack.c.bf16 %v1860_v3, %v1854_v1  ;;  %p1640_p8 = scmp.ne.s32.totalorder %s1952_s8, %s1639_s29  ;;  %s1643_s6 = sshll.u32 %s1726_s30, 4  ;;  %s1644_s6 = int_to_ptr.vmem [resolvable:$false] %s1643_s6 }
  0x40   : > { %1465 = vmatprep.subr.bf16.mxu1 %v1464_v4  ;;  %s1645_s12 = scalar_lea.vmem %s1644_s6, 1024  ;;  %p1646_p1 = scmp.lt.s32.totalorder %s1952_s8, %s1644_s6 }
  0x41   : > { %1467 = vmatpush3.bf16.msra.mxu1 %v1464_v4  ;;  %v391_v4 = vld [vmem:[%s2010_s2 + $0x28] sm:$0xff]  ;;  %p1641_p11 = pnand %p1640_p8, %p2024_p10  ;;  %p1647_p3 = scmp.lt.s32.totalorder %s1645_s12, %s1639_s29 }
  0x42   : > { %235 = vadd.xlane.f32.xlu0 %v1858_v2  ;;  %239 = vadd.xlane.f32.xlu1 %v1860_v3 }
  0x43   : > { %1469 = vmatprep.subr.bf16.mxu1 %v1468_v5  ;;  %p1642_p13 = pneg %p1641_p11  ;;  %p1648_p5 = por %p1647_p3, %p1646_p1 }
  0x45   : > { %1471 = vmatpush3.bf16.msra.mxu1 %v1468_v5  ;;  %v392_v5 = vld [vmem:[%s2010_s2 + $0x30] sm:$0xff]  ;;  %p1649_p6 = pnand %p1648_p5, %p1642_p13 }
  0x48   : > { %1361 = vmatmul.mubr.msk.f32.vlgmr.msra.gmra.mrb[0].mxu1 %vm288_vm0, %v387_v7 }
  0x49   : > { %1363 = vmatprep.mubr.msk.f32.mxu1 %vm288_vm0, %v388_v8 }
  0x4c   : > { %1364 = vmatmul.mubr.msk.f32.gmra.mrb[2].mxu1 %vm288_vm0, %v389_v9 }
  0x4d   : > { %1366 = vmatprep.mubr.msk.f32.mxu1 %vm288_vm0, %v390_v63 }
  0x50   : > { %1367 = vmatmul.mubr.msk.f32.gmra.mrb[4].mxu1 %vm288_vm0, %v391_v4 }
  0x51   : > { %1369 = vmatprep.mubr.msk.f32.mxu1 %vm288_vm0, %v392_v5 }
  0x54   : > { %1370 = vmatmul.mubr.msk.f32.gmra.mrb[6].mxu1 %vm288_vm0, %v393_v6 }
  0xcb   : > { %v234_v12 = vpop.xlane.xlu0 %233  ;;  %v238_v13 = vpop.xlane.xlu1 %237 }
  0xcc   : > { %v241_v14 = vmul.f32 0.0625, %v234_v12  ;;  %v243_v15 = vmul.f32 0.0625, %v238_v13 }
  0xce   : > { %v245_v16 = vsub.f32 %v1852_v0, %v241_v14  ;;  %v247_v17 = vsub.f32 %v1854_v1, %v243_v15 }
  0xcf   : > { %v236_v18 = vpop.xlane.xlu0 %235  ;;  %v240_v19 = vpop.xlane.xlu1 %239 }
  0xd0   : > { %v242_v20 = vmul.f32 0.0625, %v236_v18  ;;  %v244_v21 = vmul.f32 0.0625, %v240_v19  ;;  %v252_v22 = vsel %vm251_vm1, %v245_v16, 0.0  ;;  %v254_v23 = vsel %vm251_vm1, %v247_v17, 0.0 }
  0xd1   : > { %v256_v24 = vmul.f32 %v252_v22, %v252_v22  ;;  %v258_v27 = vmul.f32 %v254_v23, %v254_v23 }
  0xd2   : > { %v246_v25 = vsub.f32 %v1858_v2, %v242_v20  ;;  %v248_v26 = vsub.f32 %v1860_v3, %v244_v21 }
  0xd3   : > { %260 = vadd.xlane.f32.xlu0 %v256_v24 }
  0xd4   : > { %v253_v28 = vsel %vm251_vm1, %v246_v25, 0.0  ;;  %v255_v29 = vsel %vm251_vm1, %v248_v26, 0.0 }
  0xd5   : > { %v257_v30 = vmul.f32 %v253_v28, %v253_v28  ;;  %v259_v31 = vmul.f32 %v255_v29, %v255_v29 }
  0xd7   : > { %264 = vadd.xlane.f32.xlu0 %v258_v27  ;;  %262 = vadd.xlane.f32.xlu1 %v257_v30 }
  0xdb   : > { %266 = vadd.xlane.f32.xlu1 %v259_v31 }
 0x11b   : > { %v1362_v33 = vpop.f32.mrb[0].mxu1 }
 0x11c   : > { %v484_v34 = vpop.f32.mrb[1].mxu1 }
 0x11d   : > { %551 = vxpose.xlu0.b32.start [1/4] (short) %v484_v34, 128 }
 0x11f   : > { %v1365_v35 = vpop.f32.mrb[2].mxu1 }
 0x120   : > { %v494_v36 = vpop.f32.mrb[3].mxu1 }
 0x121   : > { %552 = vxpose.xlu0.b32.cont [2/4] (short) %v1362_v33, 128 }
 0x123   : > { %v1922_v14 = vpop.f32.mrb[4].mxu1 }
 0x124   : > { %v504_v15 = vpop.f32.mrb[5].mxu1 }
 0x125   : > { %553 = vxpose.xlu0.b32.cont [3/4] (short) %v494_v36, 128  ;;  %1436 = vmatprep.mubr.f32.mxu1 %v504_v15 }
 0x129   : > { %554 = vxpose.xlu0.b32.end [4/4] (short) %v1365_v35, 128 }
 0x160   : > { %v261_v37 = vpop.xlane.xlu0 %260 }
 0x161   : > { %v268_v38 = vmul.f32 0.0625, %v261_v37 }
 0x163   : > { %v272_v39 = vadd.f32 1e-05, %v268_v38 }
 0x164   : > { %v263_v40 = vpop.xlane.xlu1 %262  ;;  %v265_v41 = vpop.xlane.xlu0 %264 }
 0x165   : > { %v269_v42 = vmul.f32 0.0625, %v263_v40  ;;  %v270_v43 = vmul.f32 0.0625, %v265_v41  ;;  %1595 = vrsqrt.f32 %v272_v39 }
 0x167   : > { %v273_v44 = vadd.f32 1e-05, %v269_v42  ;;  %v274_v45 = vadd.f32 1e-05, %v270_v43 }
 0x168   : > { %v267_v46 = vpop.xlane.xlu1 %266 }
 0x169   : > { %1597 = vrsqrt.f32 %v273_v44  ;;  %v271_v47 = vmul.f32 0.0625, %v267_v46 }
 0x16a   : > { %1599 = vrsqrt.f32 %v274_v45 }
 0x16b   : > { %v275_v48 = vadd.f32 1e-05, %v271_v47 }
 0x16d   : > { %1601 = vrsqrt.f32 %v275_v48 }
 0x16f   : > { %v1596_v49 = vpop.eup %1595 }
 0x170   : > { %v280_v51 = vmul.f32 %v1596_v49, %v245_v16  ;;  %v1924_v16 = vpop.f32.mrb[6].mxu1 }
 0x173   : > { %v1598_v50 = vpop.eup %1597 }
 0x174   : > { %v281_v52 = vmul.f32 %v1598_v50, %v246_v25  ;;  %v1600_v53 = vpop.eup %1599 }
 0x175   : > { %v282_v56 = vmul.f32 %v1600_v53, %v247_v17  ;;  %v1926_v17 = vpop.f32.mrb[7].mxu1 }
 0x176   : > { %v1456_v54 = vpack.c.bf16 %v281_v52, %v280_v51 }
 0x177   : > { %v1602_v55 = vpop.eup %1601 }
 0x178   : > { %1457 = vmatprep.subr.bf16.mxu0 %v1456_v54  ;;  %v283_v57 = vmul.f32 %v1602_v55, %v248_v26 }
 0x179   : > { %1459 = vmatpush3.bf16.msra.mxu0 %v1456_v54 }
 0x17a   : > { %v1460_v58 = vpack.c.bf16 %v283_v57, %v282_v56 }
 0x17c   : > { %1461 = vmatprep.subr.bf16.mxu0 %v1460_v58 }
 0x17d   : > { %1463 = vmatpush3.bf16.msra.mxu0 %v1460_v58 }
 0x180   : > { %1347 = vmatmul.mubr.msk.f32.vlgmr.msra.gmra.mrb[0].mxu0 %vm288_vm0, %v285_v59 }
 0x181   : > { %1349 = vmatprep.mubr.msk.f32.mxu0 %vm288_vm0, %v286_v60 }
 0x184   : > { %1350 = vmatmul.mubr.msk.f32.gmra.mrb[2].mxu0 %vm288_vm0, %v287_v61 }
 0x19d   : > { %v567_v62 = vpop.trf.xlu0 }
 0x19e   : > { %1380 = vmatprep.mubr.msk.f32.mxu0 %vm288_vm0, %v567_v62 }
 0x1a1   : > { %v568_v13 = vpop.trf.xlu0 }
 0x1a5   : > { %v569_v18 = vpop.trf.xlu0 }
 0x1a9   : > { %v570_v19 = vpop.trf.xlu0 }
 0x1ad   : > { %v571_v20 = vpop.trf.xlu0 }
 0x1b1   : > { %v572_v21 = vpop.trf.xlu0 }
 0x1b5   : > { %v573_v22 = vpop.trf.xlu0 }
 0x1b9   : > { %v574_v5 = vpop.trf.xlu0 }
 0x1bd   : > { %v575_v6 = vpop.trf.xlu0 }
 0x253   : > { %v1348_v7 = vpop.f32.mrb[0].mxu0 }
 0x254   : > { %v367_v8 = vpop.f32.mrb[1].mxu0 }
 0x255   : > { %v1472_v9 = vpack.c.bf16 %v1348_v7, %v367_v8  ;;  %v576_v7 = vpop.trf.xlu0 }
 0x257   : > { %v1351_v10 = vpop.f32.mrb[2].mxu0  ;;  %1473 = vmatprep.subr.bf16.mxu0 %v1472_v9 }
 0x258   : > { %v377_v11 = vpop.f32.mrb[3].mxu0  ;;  %1475 = vmatpush3.bf16.msra.mxu0 %v1472_v9 }
 0x259   : > { %v1476_v12 = vpack.c.bf16 %v1351_v10, %v377_v11  ;;  %v577_v8 = vpop.trf.xlu0 }
 0x25b   : > { %1477 = vmatprep.subr.bf16.mxu0 %v1476_v12 }
 0x25c   : > { %1479 = vmatpush3.bf16.msra.mxu0 %v1476_v12 }
 0x25d   : > { %v578_v9 = vpop.trf.xlu0 }
 0x25f   : > { %1381 = vmatmul.mubr.msk.f32.vlgmr.msra.gmra.mrb[4].mxu0 %vm288_vm0, %v568_v13 }
 0x260   : > { %1383 = vmatprep.mubr.msk.f32.mxu0 %vm288_vm0, %v569_v18 }
 0x261   : > { %v579_v10 = vpop.trf.xlu0 }
 0x263   : > { %1384 = vmatmul.mubr.msk.f32.gmra.mrb[6].mxu0 %vm288_vm0, %v570_v19 }
 0x264   : > { %1386 = vmatprep.mubr.msk.f32.mxu0 %vm288_vm0, %v571_v20 }
 0x265   : > { %v580_v11 = vpop.trf.xlu0 }
 0x267   : > { %1387 = vmatmul.mubr.msk.f32.gmra.mrb[8].mxu0 %vm288_vm0, %v572_v21 }
 0x268   : > { %1389 = vmatprep.mubr.msk.f32.mxu0 %vm288_vm0, %v573_v22 }
 0x269   : > { %v581_v12 = vpop.trf.xlu0 }
 0x26b   : > { %1390 = vmatmul.mubr.msk.f32.gmra.mrb[10].mxu0 %vm288_vm0, %v574_v5 }
 0x26c   : > { %1392 = vmatprep.mubr.msk.f32.mxu0 %vm288_vm0, %v575_v6 }
 0x26d   : > { %v582_v13 = vpop.trf.xlu0 }
 0x26f   : > { %1393 = vmatmul.mubr.msk.f32.gmra.mrb[12].mxu0 %vm288_vm0, %v576_v7 }
 0x270   : > { %1395 = vmatprep.mubr.msk.f32.mxu0 %vm288_vm0, %v577_v8 }
 0x273   : > { %1396 = vmatmul.mubr.msk.f32.gmra.mrb[14].mxu0 %vm288_vm0, %v578_v9 }
 0x274   : > { %1398 = vmatprep.mubr.msk.f32.mxu0 %vm288_vm0, %v579_v10 }
 0x277   : > { %1399 = vmatmul.mubr.msk.f32.gmra.mrb[16].mxu0 %vm288_vm0, %v580_v11 }
 0x278   : > { %1401 = vmatprep.mubr.msk.f32.mxu0 %vm288_vm0, %v581_v12 }
 0x27b   : > { %1402 = vmatmul.mubr.msk.f32.gmra.mrb[18].mxu0 %vm288_vm0, %v582_v13 }
 0x332   : > { %v1382_v23 = vpop.f32.mrb[4].mxu0 }
 0x333   : > { %v827_v24 = vmax.f32 %v1382_v23, -1e+30  ;;  %v698_v25 = vpop.f32.mrb[5].mxu0 }
 0x334   : > { %v826_v26 = vmax.f32 %v698_v25, -1e+30 }
 0x335   : > { %v831_v27 = vmax.f32 %v827_v24, -1e+30 }
 0x336   : > { %v830_v28 = vmax.f32 %v826_v26, -1e+30 }
 0x337   : > { %v835_v29 = vmax.f32 %v831_v27, -1e+30 }
 0x338   : > { %v834_v30 = vmax.f32 %v830_v28, -1e+30 }
 0x33a   : > { %v838_v31 = vmax.f32 %v834_v30, %v835_v29 }
 0x33c   : > { %v840_v32 = vmax.f32 %v838_v31, -1e+30 }
 0x33e   : > { %v841_v33 = vrot.slane %v840_v32, 4 }
 0x340   : > { %v842_v34 = vmax.f32 %v840_v32, %v841_v33 }
 0x342   : > { %v843_v35 = vrot.slane %v842_v34, 2 }
 0x344   : > { %v844_v36 = vmax.f32 %v842_v34, %v843_v35 }
 0x346   : > { %v845_v37 = vrot.slane %v844_v36, 1 }
 0x348   : > { %v846_v38 = vmax.f32 %v844_v36, %v845_v37  ;;  %v1007_v37 = vld [vmem:[#allocation4 + $0x8] sm:$0xff] }
 0x34a   : > { %v847_v39 = vsub.f32 %v698_v25, %v846_v38  ;;  %v848_v40 = vsub.f32 %v1382_v23, %v846_v38  ;;  %v849_v41 = vsub.f32 -1e+30, %v846_v38  ;;  %v1009_v38 = vld [vmem:[#allocation4 + $0x18] sm:$0xff] }
 0x34c   : > { %v863_v42 = vmul.f32 1.442695, %v847_v39  ;;  %v865_v43 = vmul.f32 1.442695, %v848_v40  ;;  %v867_v44 = vmul.f32 1.442695, %v849_v41 }
 0x34e   : > { %1603 = vpow2.f32 %v863_v42 }
 0x34f   : > { %1605 = vpow2.f32 %v865_v43 }
 0x350   : > { %1607 = vpow2.f32 %v867_v44 }
 0x358   : > { %v1604_v45 = vpop.eup %1603 }
 0x359   : > { %v1606_v46 = vpop.eup %1605 }
 0x35a   : > { %v1608_v47 = vpop.eup %1607  ;;  %v895_v48 = vadd.f32 %v1606_v46, %v1604_v45  ;;  %v1480_v49 = vpack.c.bf16 %v1606_v46, %v1604_v45 }
 0x35b   : > { %v1484_v51 = vpack.c.bf16 %v1608_v47, %v1608_v47 }
 0x35c   : > { %v896_v50 = vadd.f32 %v1608_v47, %v895_v48  ;;  %1481 = vmatprep.subr.bf16.mxu1 %v1480_v49 }
 0x35d   : > { %1483 = vmatpush3.bf16.msra.mxu1 %v1480_v49 }
 0x35e   : > { %v897_v52 = vadd.f32 %v1608_v47, %v896_v50  ;;  %1485 = vmatprep.subr.bf16.mxu1 %v1484_v51 }
 0x360   : > { %v898_v53 = vadd.f32 %v1608_v47, %v897_v52 }
 0x361   : > { %1487 = vmatpush3.bf16.msra.mxu1 %v1484_v51 }
 0x362   : > { %v899_v54 = vadd.f32 %v1608_v47, %v898_v53  ;;  %1489 = vmatprep.subr.bf16.mxu1 %v1484_v51 }
 0x364   : > { %v900_v55 = vadd.f32 %v1608_v47, %v899_v54 }
 0x365   : > { %1491 = vmatpush3.bf16.msra.mxu1 %v1484_v51 }
 0x366   : > { %v901_v56 = vadd.f32 %v1608_v47, %v900_v55  ;;  %1493 = vmatprep.subr.bf16.mxu1 %v1484_v51 }
 0x368   : > { %v902_v57 = vadd.f32 %v1608_v47, %v901_v56 }
 0x369   : > { %1495 = vmatpush3.bf16.msra.mxu1 %v1484_v51 }
 0x36a   : > { %v903_v58 = vadd.f32 %v1608_v47, %v902_v57  ;;  %1497 = vmatprep.subr.bf16.mxu1 %v1484_v51 }
 0x36c   : > { %v904_v59 = vadd.f32 %v1608_v47, %v903_v58 }
 0x36d   : > { %1499 = vmatpush3.bf16.msra.mxu1 %v1484_v51 }
 0x36e   : > { %v905_v60 = vadd.f32 %v1608_v47, %v904_v59  ;;  %1501 = vmatprep.subr.bf16.mxu1 %v1484_v51 }
 0x370   : > { %v906_v61 = vadd.f32 %v1608_v47, %v905_v60 }
 0x371   : > { %1503 = vmatpush3.bf16.msra.mxu1 %v1484_v51 }
 0x372   : > { %v907_v62 = vadd.f32 %v1608_v47, %v906_v61  ;;  %1505 = vmatprep.subr.bf16.mxu1 %v1484_v51 }
 0x374   : > { %v908_v63 = vadd.f32 %v1608_v47, %v907_v62 }
 0x375   : > { %1507 = vmatpush3.bf16.msra.mxu1 %v1484_v51 }
 0x376   : > { %v909_v4 = vadd.f32 %v1608_v47, %v908_v63  ;;  %1509 = vmatprep.subr.bf16.mxu1 %v1484_v51 }
 0x378   : > { %v910_v20 = vrot.slane %v909_v4, 4 }
 0x379   : > { %1511 = vmatpush3.bf16.msra.mxu1 %v1484_v51 }
 0x37a   : > { %v911_v21 = vadd.f32 %v910_v20, %v909_v4 }
 0x37c   : > { %1437 = vmatmul.mubr.f32.vlgmr.msra.gmra.mrb[8].mxu1 %v1922_v14  ;;  %v1385_v14 = vpop.f32.mrb[6].mxu0  ;;  %v912_v22 = vrot.slane %v911_v21, 2 }
 0x37d   : > { %1439 = vmatprep.mubr.f32.mxu1 %v1926_v17  ;;  %v708_v15 = vpop.f32.mrb[7].mxu0  ;;  %v1008_v17 = vld [vmem:[#allocation4 + $0x10] sm:$0xff] }
 0x37e   : > { %v1388_v18 = vpop.f32.mrb[8].mxu0  ;;  %v913_v23 = vadd.f32 %v912_v22, %v911_v21 }
 0x37f   : > { %v718_v19 = vpop.f32.mrb[9].mxu0 }
 0x380   : > { %1440 = vmatmul.mubr.f32.gmra.mrb[10].mxu1 %v1924_v16  ;;  %v1006_v16 = vld [vmem:[#allocation4] sm:$0xff]  ;;  %v914_v24 = vrot.slane %v913_v23, 1  ;;  %v1391_v39 = vpop.f32.mrb[10].mxu0 }
 0x381   : > { %1450 = vmatprep.mubr.msk.f32.mxu0 %vm288_vm0, %v1006_v16  ;;  %1453 = vmatprep.mubr.msk.f32.mxu1 %vm288_vm0, %v1008_v17  ;;  %v728_v40 = vpop.f32.mrb[11].mxu0 }
 0x382   : > { %v915_v25 = vadd.f32 %v914_v24, %v913_v23  ;;  %v1394_v41 = vpop.f32.mrb[12].mxu0 }
 0x383   : > { %v738_v42 = vpop.f32.mrb[13].mxu0 }
 0x384   : > { %1609 = vrcp.f32 %v915_v25  ;;  %v1397_v43 = vpop.f32.mrb[14].mxu0 }
 0x385   : > { %v748_v44 = vpop.f32.mrb[15].mxu0 }
 0x386   : > { %v1400_v45 = vpop.f32.mrb[16].mxu0 }
 0x387   : > { %v758_v46 = vpop.f32.mrb[17].mxu0 }
 0x388   : > { %v1403_v47 = vpop.f32.mrb[18].mxu0 }
 0x389   : > { %v768_v48 = vpop.f32.mrb[19].mxu0 }
 0x38e   : > { %v1610_v26 = vpop.eup %1609 }
 0x44f   : > { %v1438_v27 = vpop.f32.mrb[8].mxu1 }
 0x450   : > { %v1003_v28 = vmul.f32 %v1610_v26, %v1438_v27  ;;  %v982_v29 = vpop.f32.mrb[9].mxu1 }
 0x451   : > { %v1002_v30 = vmul.f32 %v1610_v26, %v982_v29 }
 0x453   : > { %v1512_v31 = vpack.c.bf16 %v1003_v28, %v1002_v30  ;;  %v1441_v32 = vpop.f32.mrb[10].mxu1 }
 0x454   : > { %v1005_v33 = vmul.f32 %v1610_v26, %v1441_v32  ;;  %v992_v34 = vpop.f32.mrb[11].mxu1 }
 0x455   : > { %v1004_v35 = vmul.f32 %v1610_v26, %v992_v34  ;;  %1513 = vmatprep.subr.bf16.mxu0 %v1512_v31  ;;  %1520 = vmatprep.subr.bf16.mxu1 %v1512_v31 }
 0x456   : > { %1515 = vmatpush3.bf16.msra.mxu0 %v1512_v31  ;;  %1522 = vmatpush3.bf16.msra.mxu1 %v1512_v31 }
 0x457   : > { %v1516_v36 = vpack.c.bf16 %v1005_v33, %v1004_v35 }
 0x459   : > { %1517 = vmatprep.subr.bf16.mxu0 %v1516_v36  ;;  %1521 = vmatprep.subr.bf16.mxu1 %v1516_v36 }
 0x45a   : > { %1519 = vmatpush3.bf16.msra.mxu0 %v1516_v36  ;;  %1523 = vmatpush3.bf16.msra.mxu1 %v1516_v36 }
 0x45d   : > { %1451 = vmatmul.mubr.msk.f32.vlgmr.msra.gmra.mrb[20].mxu0 %vm288_vm0, %v1007_v37  ;;  %1454 = vmatmul.mubr.msk.f32.vlgmr.msra.gmra.mrb[12].mxu1 %vm288_vm0, %v1009_v38 }
 0x530   : > { %v1452_v49 = vpop.f32.mrb[20].mxu0  ;;  %v1455_v50 = vpop.f32.mrb[12].mxu1 }
 0x531   : > { %v1113_v51 = vadd.f32 %v1452_v49, %v1858_v2  ;;  %v1115_v52 = vadd.f32 %v1455_v50, %v1860_v3  ;;  %v1088_v53 = vpop.f32.mrb[21].mxu0  ;;  %v1098_v54 = vpop.f32.mrb[13].mxu1 }
 0x532   : > { %v1112_v55 = vadd.f32 %v1088_v53, %v1852_v0  ;;  %v1114_v56 = vadd.f32 %v1098_v54, %v1854_v1 }
 0x533   : > { %1117 = vst [vmem:[%s219_s5 + $0x8] sm:$0xff] %v1113_v51  ;;  %1119 = vst [vmem:[%s219_s5 + $0x18] sm:$0xff] %v1115_v52 }
 0x534   : > { %1116 = vst [vmem:[%s219_s5] sm:$0xff] %v1112_v55  ;;  %1118 = vst [vmem:[%s219_s5 + $0x10] sm:$0xff] %v1114_v56 }
 0x535   : > { %1652 = shalt.err (!%p1649_p6)
}
 0x536   : > { %s1653_s13 = scalar_lea.hbm %s1958_s11, 512  ;;  %s1657_s22 = scalar_lea.hbm %s2012_s4, 1024 }
 0x537   : > { %p1654_p7 = scmp.ne.s32.totalorder %s1958_s11, %s1653_s13  ;;  %p1658_p0 = scmp.lt.u32.totalorder %s1958_s11, %s2012_s4 }
 0x538   : > { %p1659_p2 = scmp.lt.u32.totalorder %s1657_s22, %s1653_s13  ;;  %p1661_p8 = scmp.lt.u32.totalorder %s1653_s13, %s1958_s11 }
 0x539   : > { %p1655_p9 = pnand %p1654_p7, %p2024_p10 }
 0x53a   : > { %p1660_p4 = por %p1659_p2, %p1658_p0 }
 0x53b   : > { %p1656_p12 = pneg %p1655_p9 }
 0x53c   : > { %p1662_p11 = por %p1661_p8, %p1660_p4 }
 0x53e   : > { %p1663_p13 = pnand %p1662_p11, %p1656_p12 }
 0x540   : > { %1666 = shalt.err (!%p1663_p13)
}
 0x541   : > { %s1727_s5 = smov 128   ;;  %s1728_s9 = smov 8  }
 0x542   : > { %1528 = dma.vmem_to_hbm [thread:$0]  (%p2024_p10), %s1952_s8, 512, %s1958_s11, %s1962_s18, %s1727_s5, %s1727_s5, %s1728_s9  }
 0x543 PF: > { %p1540_p1 = scmp.ge.s32.totalorder %s1721_s20, 2  ;;  %s1150_s10 = sand.u32 1, %s1701_s15  }
 0x544   : > { %p2025_p3 = scmp.ne.s32.totalorder %s2018_s27, 0  ;;  %s1151_s7 = scalar_lea.sflag [#allocation6], %s1150_s10 }
 0x546   : > { %p1535_p5 = pnand %p1540_p1, %p2025_p3 }
 0x548   : > { %1696 = dma.done.wait (!%p1535_p5), %s1151_s7, 512  }
 0x549   : > { %1698 = vsyncadd (!%p1535_p5), %s1151_s7, 4294966784  ;;  %s18_s20 = sadd.s32 1, %s1721_s20   ;;  %s2026_s15 = smov %s1705_s16 }
 0x54a   : > { %p15_p6 = scmp.ge.s32.totalorder %s18_s20, 4   ;;  %s2027_s16 = smov %s1709_s17 }
 0x54b   : > { %s2028_s17 = smov %s1807_s28  ;;  %s2029_s18 = smov %s1717_s19 }
 0x54c   : > { %s2030_s19 = smov %s2032_s23  ;;  %17 = sbr.rel (!%p15_p6) target bundleno = 5 (0x5), region = 82 }
 0x553   :  { %1156 = vsyncpa [#allocation5], 1 }
 0x554   :  { %1158 = vsyncpa [#allocation5 + $0x1], 1 }
 0x555   :  { %1159 = vsyncpa [#allocation6], 1 }
 0x556   :  { %1161 = vsyncpa [#allocation6 + $0x1], 1 }

</bundles_post_ra>
